<compile_context>
chip_gen: v6e
topology: v6e:2x2x1
jax: 0.10.0
libtpu: 0.0.40
codegen_flags: <defaults>
</compile_context>

<pallas_src>
import math

import jax
import jax.numpy as jnp
from jax import lax
from jax.experimental import pallas as pl
from jax.experimental.pallas import tpu as pltpu


# ------------------------------------------------------------------ kernels -

def _small_linear_kernel(x_ref, w_ref, b_ref, o_ref):
    # x_ref: [B, K]   w_ref: [E, K] (torch layout)   b_ref: [1, E]   o: [B, E]
    acc = lax.dot_general(
        x_ref[...], w_ref[...],
        dimension_numbers=(((1,), (1,)), ((), ())),   # contract K with K
        preferred_element_type=jnp.float32,
    )
    o_ref[...] = (acc + b_ref[...]).astype(o_ref.dtype)


def _tiled_linear_kernel(x_ref, w_ref, b_ref, o_ref, acc_ref):
    # x_ref: [B, TK]  w_ref: [TE, TK]  b_ref: [1, TE]  o_ref: [B, TE]
    # acc_ref: [B, TE] f32 scratch, resident across the K (reduction) axis.
    k = pl.program_id(1)

    @pl.when(k == 0)
    def _():
        acc_ref[...] = jnp.zeros_like(acc_ref)

    acc_ref[...] += lax.dot_general(
        x_ref[...], w_ref[...],
        dimension_numbers=(((1,), (1,)), ((), ())),
        preferred_element_type=jnp.float32,
    )

    @pl.when(k == pl.num_programs(1) - 1)
    def _():
        o_ref[...] = (acc_ref[...] + b_ref[...]).astype(o_ref.dtype)


# ------------------------------------------------------------------ wrapper -

_TE_MAX = 512                     # output-feature tile (multiple of 128)
_TK_MAX = 2048                    # reduction-dim tile
_SMALL_BYTES = 2 * 1024 * 1024    # below this, skip the grid entirely


def _pick_tile(dim, cap, granule):
    """Largest multiple of `granule` that divides `dim` and is <= cap."""
    if dim <= cap:
        return dim
    t = (cap // granule) * granule
    while t >= granule:
        if dim % t == 0:
            return t
        t -= granule
    return dim  # no clean divisor: fall back to one full-width block


def simple_head_forward(x, weight, bias):
    """Forward of SimpleHead: nn.Flatten() + nn.Linear(K, E).

    x:      [B, C, H, W] (flattened row-major, identical to torch.nn.Flatten)
    weight: [E, K]  -- torch nn.Linear layout, NOT transposed
    bias:   [E]
    returns [B, E]
    """
    B = x.shape[0]
    E, K = weight.shape
    x2d = x.reshape(B, K)        # Flatten (row-major == torch)
    b2d = bias.reshape(1, E)     # 2D for TPU layout

    itemsize = jnp.dtype(x.dtype).itemsize
    total_bytes = (B * K + E * K + E + B * E) * itemsize

    if total_bytes <= _SMALL_BYTES:
        # Toy / small problem: single block, no grid, minimal fixed overhead.
        return pl.pallas_call(
            _small_linear_kernel,
            out_shape=jax.ShapeDtypeStruct((B, E), x.dtype),
            in_specs=[
                pl.BlockSpec(memory_space=pltpu.MemorySpace.VMEM),
                pl.BlockSpec(memory_space=pltpu.MemorySpace.VMEM),
                pl.BlockSpec(memory_space=pltpu.MemorySpace.VMEM),
            ],
            out_specs=pl.BlockSpec(memory_space=pltpu.MemorySpace.VMEM),
            cost_estimate=pl.CostEstimate(
                flops=2 * B * K * E,
                transcendentals=0,
                bytes_accessed=total_bytes,
            ),
        )(x2d, weight, b2d)

    # General path: tile E (parallel) and K (reduction, last, 'arbitrary').
    te = _pick_tile(E, _TE_MAX, 128)
    tk = _pick_tile(K, _TK_MAX, 128)

    return pl.pallas_call(
        _tiled_linear_kernel,
        out_shape=jax.ShapeDtypeStruct((B, E), x.dtype),
        grid_spec=pltpu.PrefetchScalarGridSpec(
            num_scalar_prefetch=0,
            grid=(E // te, K // tk),
            in_specs=[
                pl.BlockSpec((B, tk), lambda j, k: (0, k)),    # activations
                pl.BlockSpec((te, tk), lambda j, k: (j, k)),   # weight [E, K]
                pl.BlockSpec((1, te), lambda j, k: (0, j)),    # bias
            ],
            out_specs=pl.BlockSpec((B, te), lambda j, k: (0, j)),
            scratch_shapes=[pltpu.VMEM((B, te), jnp.float32)],
        ),
        compiler_params=pltpu.CompilerParams(
            # E tiles shard across v7x's two TensorCores; K is the reduction.
            dimension_semantics=("parallel", "arbitrary"),
            # Double-buffered working set with the caps above is ~8 MiB, so
            # 32 MiB is safe on every generation (incl. v7x's 64 MiB VMEM).
            vmem_limit_bytes=32 * 1024 * 1024,
        ),
    )(x2d, weight, b2d)


# --------------------------------------------------------------------- main -

if __name__ == "__main__":
    key = jax.random.PRNGKey(0)

    def make_inputs(k, B, C, H, W, E):
        K = C * H * W
        kx, kw, kb = jax.random.split(k, 3)
        xx = jax.random.normal(kx, (B, C, H, W), dtype=jnp.float32)
        bound = 1.0 / math.sqrt(K)
        ww = jax.random.uniform(kw, (E, K), dtype=jnp.float32,
                                minval=-bound, maxval=bound)
        bb = jax.random.uniform(kb, (E,), dtype=jnp.float32,
                                minval=-bound, maxval=bound)
        return xx, ww, bb

    k1, k2 = jax.random.split(key)

    # 1) Small shape (single-block fast path): B=8, C=2, H=4, W=8 -> K=64, E=128.
    x, w, b = make_inputs(k1, 8, 2, 4, 8, 128)
    out = jax.block_until_ready(simple_head_forward(x, w, b))
    ref = x.reshape(x.shape[0], -1) @ w.T + b
    assert out.shape == ref.shape
    assert jnp.allclose(out, ref, atol=1e-5, rtol=1e-5)

    # 2) Larger shape exercising the tiled/pipelined path:
    #    B=8, C=8, H=16, W=32 -> K=4096, E=1024 -> grid (2, 2).
    x, w, b = make_inputs(k2, 8, 8, 16, 32, 1024)
    out = jax.block_until_ready(simple_head_forward(x, w, b))
    ref = x.reshape(x.shape[0], -1) @ w.T + b
    assert out.shape == ref.shape
    assert jnp.allclose(out, ref, atol=1e-4, rtol=1e-4)

    print("KERNEL_OK")
</pallas_src>

<mosaic_0001>
module attributes {stable_mosaic.version = 11 : i64} {
  func.func @_small_linear_kernel(%arg0: memref<8x64xf32, #tpu.memory_space<vmem>>, %arg1: memref<128x64xf32, #tpu.memory_space<vmem>>, %arg2: memref<1x128xf32, #tpu.memory_space<vmem>>, %arg3: memref<8x128xf32, #tpu.memory_space<vmem>>) attributes {dimension_semantics = [], scalar_prefetch = 0 : i64, scratch_operands = 0 : i64, tpu.core_type = #tpu.core_type<tc>} {
    %c0 = arith.constant 0 : index
    %c0_0 = arith.constant 0 : index
    %0 = vector.load %arg0[%c0, %c0_0] : memref<8x64xf32, #tpu.memory_space<vmem>>, vector<8x64xf32>
    %c0_1 = arith.constant 0 : index
    %c0_2 = arith.constant 0 : index
    %1 = vector.load %arg1[%c0_1, %c0_2] : memref<128x64xf32, #tpu.memory_space<vmem>>, vector<128x64xf32>
    %cst = arith.constant dense<0.000000e+00> : vector<8x128xf32>
    %2 = tpu.matmul %0, %1, %cst {dimension_numbers = #tpu.dot_dimension_numbers<[1], [1], [0], [0], [0, 0, 1, 0], [], []>} : vector<8x64xf32>, vector<128x64xf32>, vector<8x128xf32> -> vector<8x128xf32>
    %c0_3 = arith.constant 0 : index
    %c0_4 = arith.constant 0 : index
    %3 = vector.load %arg2[%c0_3, %c0_4] : memref<1x128xf32, #tpu.memory_space<vmem>>, vector<1x128xf32>
    %4 = vector.broadcast %3 : vector<1x128xf32> to vector<8x128xf32>
    %5 = arith.addf %2, %4 : vector<8x128xf32>
    %c0_5 = arith.constant 0 : index
    %c0_6 = arith.constant 0 : index
    %6 = vector.load %arg3[%c0_5, %c0_6] : memref<8x128xf32, #tpu.memory_space<vmem>>, vector<8x128xf32>
    tpu.vector_store %arg3[%c0_5, %c0_6], %5 {strides = array<i32>} : memref<8x128xf32, #tpu.memory_space<vmem>>, vector<8x128xf32>,
    return
  }
}

</mosaic_0001>

<bundles_post_ra>
// kernel: tpu_custom_call.1
= control target key start
LH: loop header
LB: loop body
LE: loop exit
PB: predicated region body
PF: predicated region fallthrough
CT: control target
= control target key end

     0   :  { %vm39_vm0 = vcmask 523264   ;;  %v271_v1 = vmov 0.0   ;;  %vm272_vm1 = vmmov 0   ;;  %s368_s0 = inlined_call_operand.vmem [shape: f32[8,64], index: 0, kind: input, shape index: {}]   ;;  %s369_s1 = inlined_call_operand.vmem [shape: f32[128,64], index: 1, kind: input, shape index: {}]   ;;  %s370_s2 = inlined_call_operand.vmem [shape: f32[1,128], index: 2, kind: input, shape index: {}]   ;;  %s371_s3 = inlined_call_operand.hbm [shape: f32[8,128], index: 3, kind: output, shape index: {}]  }
   0x1   :  { %v31_v0 = vld [vmem:[%s369_s1 + $0x78] sm:$0xff]  ;;  %211 = vmatprep.subr.mxu0 %v271_v1  ;;  %243 = vmatprep.mubr.msk.f32.mxu0 %vm272_vm1, %v271_v1  ;;  %v30_v2 = vld [vmem:[%s369_s1 + $0x70] sm:$0xff] }
   0x2   :  { %212 = vmatpush3.xpose.msk.msra.mxu0 %vm39_vm0, %v31_v0 }
   0x3   :  { %213 = vmatprep.subr.mxu0 %v271_v1 }
   0x6   :  { %214 = vmatpush3.xpose.msk.msra.mxu0 %vm39_vm0, %v30_v2 }
   0x7   :  { %8 = vsyncpa [#allocation3], 0  ;;  %215 = vmatprep.subr.mxu0 %v271_v1  ;;  %v29_v3 = vld [vmem:[%s369_s1 + $0x68] sm:$0xff]  ;;  %v28_v4 = vld [vmem:[%s369_s1 + $0x60] sm:$0xff]  ;;  %s273_s21 = smov [#allocation2]  }
   0x8   :  { %v27_v5 = vld [vmem:[%s369_s1 + $0x58] sm:$0xff]  ;;  %v26_v6 = vld [vmem:[%s369_s1 + $0x50] sm:$0xff]  ;;  %v25_v7 = vld [vmem:[%s369_s1 + $0x48] sm:$0xff]  ;;  %s168_s22 = sshll.u32 %s273_s21, 4  ;;  %s169_s22 = int_to_ptr.vmem [resolvable:$true] %s168_s22 }
   0x9   :  { %v24_v8 = vld [vmem:[%s369_s1 + $0x40] sm:$0xff]  ;;  %v23_v9 = vld [vmem:[%s369_s1 + $0x38] sm:$0xff]  ;;  %v22_v10 = vld [vmem:[%s369_s1 + $0x30] sm:$0xff]  ;;  %p254_p1 = scmp.lt.s32.totalorder %s169_s22, %s169_s22 }
   0xa   :  { %216 = vmatpush3.xpose.msk.msra.mxu0 %vm39_vm0, %v29_v3  ;;  %v21_v11 = vld [vmem:[%s369_s1 + $0x28] sm:$0xff]  ;;  %v20_v12 = vld [vmem:[%s369_s1 + $0x20] sm:$0xff]  ;;  %v19_v13 = vld [vmem:[%s369_s1 + $0x18] sm:$0xff] }
   0xb   :  { %217 = vmatprep.subr.mxu0 %v271_v1  ;;  %v18_v14 = vld [vmem:[%s369_s1 + $0x10] sm:$0xff]  ;;  %v17_v15 = vld [vmem:[%s369_s1 + $0x8] sm:$0xff]  ;;  %v16_v16 = vld [vmem:[%s369_s1] sm:$0xff]  ;;  %s249_s1 = scalar_lea.vmem %s169_s22, 128 }
   0xc   :  { %v15_v17 = vld [vmem:[%s368_s0] sm:$0xff]  ;;  %p250_p0 = scmp.ne.s32.totalorder %s169_s22, %s249_s1  ;;  %p255_p2 = scmp.lt.s32.totalorder %s249_s1, %s249_s1 }
   0xd   :  { %v176_v18 = vld [vmem:[%s370_s2] ss:$0 sm:$0xff] }
   0xe   :  { %218 = vmatpush3.xpose.msk.msra.mxu0 %vm39_vm0, %v28_v4  ;;  %p256_p3 = por %p255_p2, %p254_p1 }
   0xf   :  { %219 = vmatprep.subr.mxu0 %v271_v1 }
  0x10   :  { %p257_p4 = pnand %p256_p3, %p250_p0 }
  0x12   :  { %220 = vmatpush3.xpose.msk.msra.mxu0 %vm39_vm0, %v27_v5 }
  0x13   :  { %221 = vmatprep.subr.mxu0 %v271_v1 }
  0x16   :  { %222 = vmatpush3.xpose.msk.msra.mxu0 %vm39_vm0, %v26_v6 }
  0x17   :  { %223 = vmatprep.subr.mxu0 %v271_v1 }
  0x1a   :  { %224 = vmatpush3.xpose.msk.msra.mxu0 %vm39_vm0, %v25_v7 }
  0x1b   :  { %225 = vmatprep.subr.mxu0 %v271_v1 }
  0x1e   :  { %226 = vmatpush3.xpose.msk.msra.mxu0 %vm39_vm0, %v24_v8 }
  0x1f   :  { %227 = vmatprep.subr.mxu0 %v271_v1 }
  0x22   :  { %228 = vmatpush3.xpose.msk.msra.mxu0 %vm39_vm0, %v23_v9 }
  0x23   :  { %229 = vmatprep.subr.mxu0 %v271_v1 }
  0x26   :  { %230 = vmatpush3.xpose.msk.msra.mxu0 %vm39_vm0, %v22_v10 }
  0x27   :  { %231 = vmatprep.subr.mxu0 %v271_v1 }
  0x2a   :  { %232 = vmatpush3.xpose.msk.msra.mxu0 %vm39_vm0, %v21_v11 }
  0x2b   :  { %233 = vmatprep.subr.mxu0 %v271_v1 }
  0x2e   :  { %234 = vmatpush3.xpose.msk.msra.mxu0 %vm39_vm0, %v20_v12 }
  0x2f   :  { %235 = vmatprep.subr.mxu0 %v271_v1 }
  0x32   :  { %236 = vmatpush3.xpose.msk.msra.mxu0 %vm39_vm0, %v19_v13 }
  0x33   :  { %237 = vmatprep.subr.mxu0 %v271_v1 }
  0x36   :  { %238 = vmatpush3.xpose.msk.msra.mxu0 %vm39_vm0, %v18_v14 }
  0x37   :  { %239 = vmatprep.subr.mxu0 %v271_v1 }
  0x3a   :  { %240 = vmatpush3.xpose.msk.msra.mxu0 %vm39_vm0, %v17_v15 }
  0x3b   :  { %241 = vmatprep.subr.mxu0 %v271_v1 }
  0x3e   :  { %242 = vmatpush3.xpose.msk.msra.mxu0 %vm39_vm0, %v16_v16 }
  0x41   :  { %244 = vmatmul.mubr.msk.f32.vlgmr.msra.gmra.mxu0 %vm39_vm0, %v15_v17 }
 0x101   :  { %v157_v19 = vpop.f32.mrf.mxu0 }
 0x102   :  { %v158_v20 = vadd.f32 %v176_v18, %v157_v19 }
 0x103   :  { %v245_v21 = vpop.f32.mrf.mxu0 }
 0x104   :  { %161 = vst [vmem:[#allocation2] sm:$0xff] %v158_v20 }
 0x105   :  { %260 = shalt.err (!%p257_p4)
}
 0x106   :  { %171 = dma.vmem_to_hbm [thread:$0]  %s169_s22, 128, %s371_s3, [#allocation3]  }
 0x107   :  { %269 = dma.done.wait [#allocation3], 128  }
 0x108   :  { %270 = vsyncadd [#allocation3], 4294967168 }
 0x109   :  { %175 = vsyncpa [#allocation3], 1 }

</bundles_post_ra>
